<compile_context>
chip_gen: v6e
topology: v6e:2x2x1
jax: 0.10.0
libtpu: 0.0.40
codegen_flags: <defaults>
</compile_context>

<pallas_src>
import functools

import jax
import jax.numpy as jnp
from jax import lax
from jax.experimental import pallas as pl
from jax.experimental.pallas import tpu as pltpu

EPS = 1e-5  # torch.nn.InstanceNorm2d default eps


def _residual_block_kernel(x_ref, bmask_ref, w1s_ref, b1_ref, bskip_ref,
                           w2s_ref, b2_ref, seg_s_ref, seg_t_ref, alpha_ref,
                           o_ref, stacked_ref, *, C, W, HW, nb):
    # x_ref:       (1, C, L)    activations, L = nb*HW lanes (nb samples folded in)
    # bmask_ref:   (6, L)       rows 0..2: dy-validity, rows 3..5: dx-validity (0/1)
    # w1s_ref:     (2C, 9C)     conv1 taps stacked along K, rows C..2C-1 = fused 1x1 skip
    # b1/bskip/b2: (C, 1)
    # w2s_ref:     (C, 9C)      conv2 taps stacked along K
    # seg_s_ref:   (L, nb)      per-sample mean operator (one-hot / HW)
    # seg_t_ref:   (nb, L)      per-sample broadcast operator (one-hot)
    # alpha_ref:   (2,) SMEM    PReLU slopes
    # stacked_ref: (9C, L) VMEM scratch for the tap-stacked operand
    L = nb * HW
    x = x_ref[0]                       # (C, L)
    bm = bmask_ref[...]                # (6, L)
    b1 = b1_ref[...]
    bskip = bskip_ref[...]
    b2 = b2_ref[...]
    a1 = alpha_ref[0]
    a2 = alpha_ref[1]

    def fill_taps(inp):
        # Write the 9 rolled+boundary-masked copies into the shared scratch.
        # Row block k*C..(k+1)*C-1 holds tap k = 3*dy + dx (matches weight columns).
        for k in range(9):
            dy, dx = divmod(k, 3)
            off = (dy - 1) * W + (dx - 1)
            if off == 0:
                part = inp                                  # center tap: always valid
            else:
                m = bm[dy:dy + 1, :] * bm[3 + dx:4 + dx, :]  # (1, L)
                # shifted[p] = inp[p + off]; cross-sample wrap lands only on
                # masked (out-of-window) positions, so folding nb samples into
                # the lane axis stays exact.
                part = pltpu.roll(inp, (-off) % L, 1) * m
            stacked_ref[pl.ds(k * C, C), :] = part

    def seg_mean(t):
        # Per-sample (per lane-segment) mean, broadcast back over lanes.
        if nb == 1:
            return jnp.mean(t, axis=1, keepdims=True)        # (C, 1), broadcasts
        mu = jnp.dot(t, seg_s_ref[...],
                     precision=lax.Precision.HIGHEST,
                     preferred_element_type=jnp.float32)     # (C, nb)
        return jnp.dot(mu, seg_t_ref[...],
                       precision=lax.Precision.HIGHEST,
                       preferred_element_type=jnp.float32)   # (C, L)

    def instance_norm(t):
        m = seg_mean(t)
        d = t - m
        v = seg_mean(d * d)                                  # biased variance (PyTorch)
        return d * lax.rsqrt(v + EPS)

    def prelu(t, a):
        return jnp.where(t >= 0, t, a * t)

    # ---- conv1 (+ fused 1x1 skip): ONE matmul, K = 9C ----
    fill_taps(x)
    y1 = jnp.dot(w1s_ref[...], stacked_ref[...],
                 preferred_element_type=jnp.float32)         # (2C, L)
    conv1 = y1[:C] + b1
    skip = y1[C:] + bskip

    h = prelu(instance_norm(conv1), a1)

    # ---- conv2: ONE matmul, K = 9C (scratch reused) ----
    fill_taps(h)
    conv2 = jnp.dot(w2s_ref[...], stacked_ref[...],
                    preferred_element_type=jnp.float32) + b2  # (C, L)
    h = prelu(instance_norm(conv2), a2)

    o_ref[0] = skip + h


def _boundary_masks(H, W, nb):
    """(6, nb*HW) 0/1 masks: rows 0..2 = validity of h+dy-1, rows 3..5 = of w+dx-1."""
    HW = H * W
    idx = jnp.arange(HW)
    h = idx // W
    w = idx % W
    rows = []
    for dy in range(3):
        hh = h + dy - 1
        rows.append(((hh >= 0) & (hh < H)).astype(jnp.float32))
    for dx in range(3):
        ww = w + dx - 1
        rows.append(((ww >= 0) & (ww < W)).astype(jnp.float32))
    bm = jnp.stack(rows)                    # (6, HW)
    return jnp.tile(bm, (1, nb))            # (6, nb*HW)


def _segment_matrices(HW, nb):
    """seg_s (L, nb): mean operator; seg_t (nb, L): broadcast operator."""
    L = nb * HW
    seg_ids = jnp.repeat(jnp.arange(nb), HW)                     # (L,)
    seg_t = (seg_ids[None, :] == jnp.arange(nb)[:, None]).astype(jnp.float32)
    seg_s = seg_t.T / HW
    return seg_s, seg_t


def _pick_samples_per_step(N, max_nb=8):
    """Largest divisor of N (<= max_nb) that still leaves >= 2 grid steps (v7x balance)."""
    best = 1
    for nb in range(1, min(N, max_nb) + 1):
        if N % nb == 0 and (N // nb >= 2 or N == 1):
            best = nb
    return best


def _vmem_budget_bytes(C, L, nb):
    f32 = 4
    block = C * L * f32
    est = (
        4 * block                                   # x + out blocks, double-buffered
        + 9 * block                                 # tap-stacked scratch
        + 10 * block                                # live (C, L) temporaries
        + (2 * C * 9 * C + C * 9 * C + 3 * C
           + 6 * L + 2 * nb * L + 64) * f32         # weights, biases, masks, seg mats
    )
    # 2x headroom, clamped to a range safe on v5e / v6e / v7x (64 MiB physical VMEM).
    return int(min(max(2 * est, 4 << 20), 32 << 20))


def residual_block_pallas(x_nchw, params, samples_per_step=None):
    """Forward pass of ResidualBlock.  x_nchw: (N, C, H, W) f32 -> (N, C, H, W) f32."""
    N, C, H, W = x_nchw.shape
    HW = H * W
    nb = samples_per_step if samples_per_step is not None else _pick_samples_per_step(N)
    assert N % nb == 0, "samples_per_step must divide the batch size"
    G = N // nb
    L = nb * HW
    # TODO(synk): zero-pad HW up to a multiple of 128 for non-aligned spatial sizes
    # so output stores stay unmasked lane-dense (HW = 256 here, already aligned).

    x32 = x_nchw.astype(jnp.float32)
    # (N, C, HW) -> groups of nb samples folded into the lane axis: (G, C, nb*HW)
    x_g = x32.reshape(G, nb, C, HW).transpose(0, 2, 1, 3).reshape(G, C, L)

    bmask = _boundary_masks(H, W, nb)           # (6, L)
    seg_s, seg_t = _segment_matrices(HW, nb)    # (L, nb), (nb, L)

    def oihw_to_stacked(w_oihw):
        # (O, I, 3, 3) -> (O, 9*I); column index = (3*dy + dx)*C + i
        return jnp.transpose(w_oihw, (0, 2, 3, 1)).reshape(C, 9 * C).astype(jnp.float32)

    w1_taps = oihw_to_stacked(params["w1"])
    w2_taps = oihw_to_stacked(params["w2"])
    # Fuse the 1x1 skip as extra output rows acting on the center tap (k = 4).
    w1x1_2d = params["w1x1"][:, :, 0, 0].astype(jnp.float32)            # (C, C)
    skip_rows = jnp.zeros((C, 9 * C), jnp.float32).at[:, 4 * C:5 * C].set(w1x1_2d)
    w1_big = jnp.concatenate([w1_taps, skip_rows], axis=0)              # (2C, 9C)

    b1 = params["b1"].reshape(C, 1).astype(jnp.float32)
    b2 = params["b2"].reshape(C, 1).astype(jnp.float32)
    bskip = params["b1x1"].reshape(C, 1).astype(jnp.float32)
    alphas = jnp.stack([params["a1"], params["a2"]]).astype(jnp.float32)  # (2,)

    kernel = functools.partial(_residual_block_kernel, C=C, W=W, HW=HW, nb=nb)

    out_g = pl.pallas_call(
        kernel,
        out_shape=jax.ShapeDtypeStruct((G, C, L), jnp.float32),
        grid=(G,),
        in_specs=[
            pl.BlockSpec((1, C, L), lambda g: (g, 0, 0)),       # activations
            pl.BlockSpec((6, L), lambda g: (0, 0)),             # boundary masks
            pl.BlockSpec((2 * C, 9 * C), lambda g: (0, 0)),     # conv1 + skip weights
            pl.BlockSpec((C, 1), lambda g: (0, 0)),             # conv1 bias
            pl.BlockSpec((C, 1), lambda g: (0, 0)),             # skip bias
            pl.BlockSpec((C, 9 * C), lambda g: (0, 0)),         # conv2 weights
            pl.BlockSpec((C, 1), lambda g: (0, 0)),             # conv2 bias
            pl.BlockSpec((L, nb), lambda g: (0, 0)),            # segment mean op
            pl.BlockSpec((nb, L), lambda g: (0, 0)),            # segment broadcast op
            pl.BlockSpec(memory_space=pltpu.MemorySpace.SMEM),  # PReLU slopes
        ],
        out_specs=pl.BlockSpec((1, C, L), lambda g: (g, 0, 0)),
        scratch_shapes=[pltpu.VMEM((9 * C, L), jnp.float32)],   # tap-stacked operand
        compiler_params=pltpu.CompilerParams(
            dimension_semantics=("parallel",),                  # batch groups -> megacore
            vmem_limit_bytes=_vmem_budget_bytes(C, L, nb)),
    )(x_g, bmask, w1_big, b1, bskip, w2_taps, b2, seg_s, seg_t, alphas)

    return out_g.reshape(G, C, nb, HW).transpose(0, 2, 1, 3).reshape(N, C, H, W)


def residual_block_ref(x, params):
    """Pure-JAX reference matching torch semantics (NCHW)."""
    def conv(x, w, b, pad):
        y = lax.conv_general_dilated(
            x, w, window_strides=(1, 1), padding=((pad, pad), (pad, pad)),
            dimension_numbers=("NCHW", "OIHW", "NCHW"),
            precision=lax.Precision.HIGHEST)
        return y + b[None, :, None, None]

    def inorm(x):
        m = x.mean(axis=(2, 3), keepdims=True)
        v = ((x - m) ** 2).mean(axis=(2, 3), keepdims=True)
        return (x - m) / jnp.sqrt(v + EPS)

    def prelu(x, a):
        return jnp.where(x >= 0, x, a * x)

    y = conv(x, params["w1"], params["b1"], 1)
    y = prelu(inorm(y), params["a1"])
    y = conv(y, params["w2"], params["b2"], 1)
    y = prelu(inorm(y), params["a2"])
    skip = conv(x, params["w1x1"], params["b1x1"], 0)
    return skip + y


if __name__ == "__main__":
    N, C, H, W = 2, 4, 16, 16

    key = jax.random.PRNGKey(0)
    kx, k1, k2, k3, k4, k5, k6 = jax.random.split(key, 7)

    x = jax.random.normal(kx, (N, C, H, W), jnp.float32)

    params = {
        "w1": jax.random.normal(k1, (C, C, 3, 3), jnp.float32) * 0.1,
        "b1": jax.random.normal(k2, (C,), jnp.float32) * 0.1,
        "w2": jax.random.normal(k3, (C, C, 3, 3), jnp.float32) * 0.1,
        "b2": jax.random.normal(k4, (C,), jnp.float32) * 0.1,
        "w1x1": jax.random.normal(k5, (C, C, 1, 1), jnp.float32) * 0.1,
        "b1x1": jax.random.normal(k6, (C,), jnp.float32) * 0.1,
        "a1": jnp.float32(0.25),  # torch.nn.PReLU default init
        "a2": jnp.float32(0.25),
    }

    ref = residual_block_ref(x, params)

    # Default: 1 sample/step -> grid=(2,), balanced across v7x's two TensorCores.
    out = jax.block_until_ready(residual_block_pallas(x, params))
    assert out.shape == (N, C, H, W)
    assert jnp.allclose(out, ref, rtol=1e-2, atol=1e-2), "mismatch vs reference (nb=1)"

    # Batched path: both samples folded into the lane axis of a single grid step
    # (exercises the wide-matmul + segment-matmul InstanceNorm path).
    out_b = jax.block_until_ready(residual_block_pallas(x, params, samples_per_step=2))
    assert jnp.allclose(out_b, ref, rtol=1e-2, atol=1e-2), "mismatch vs reference (nb=2)"

    print("KERNEL_OK")
</pallas_src>

<mosaic_0001>
module attributes {stable_mosaic.version = 11 : i64} {
  func.func @_residual_block_kernel(%arg0: i32, %arg1: memref<1x4x256xf32, #tpu.memory_space<vmem>>, %arg2: memref<6x256xf32, #tpu.memory_space<vmem>>, %arg3: memref<8x36xf32, #tpu.memory_space<vmem>>, %arg4: memref<4x1xf32, #tpu.memory_space<vmem>>, %arg5: memref<4x1xf32, #tpu.memory_space<vmem>>, %arg6: memref<4x36xf32, #tpu.memory_space<vmem>>, %arg7: memref<4x1xf32, #tpu.memory_space<vmem>>, %arg8: memref<256x1xf32, #tpu.memory_space<vmem>>, %arg9: memref<1x256xf32, #tpu.memory_space<vmem>>, %arg10: memref<2xf32, #tpu.memory_space<smem>>, %arg11: memref<1x4x256xf32, #tpu.memory_space<vmem>>, %arg12: memref<36x256xf32, #tpu.memory_space<vmem>>) attributes {dimension_semantics = [#tpu.dimension_semantics<parallel>], iteration_bounds = array<i64: 2>, scalar_prefetch = 0 : i64, scratch_operands = 1 : i64, tpu.core_type = #tpu.core_type<tc>, window_params = [{transform_indices = @transform_0, window_bounds = array<i64: 1, 4, 256>}, {pipeline_mode = #tpu.pipeline_mode<synchronous>, transform_indices = @transform_1, window_bounds = array<i64: 6, 256>}, {pipeline_mode = #tpu.pipeline_mode<synchronous>, transform_indices = @transform_2, window_bounds = array<i64: 8, 36>}, {pipeline_mode = #tpu.pipeline_mode<synchronous>, transform_indices = @transform_3, window_bounds = array<i64: 4, 1>}, {pipeline_mode = #tpu.pipeline_mode<synchronous>, transform_indices = @transform_4, window_bounds = array<i64: 4, 1>}, {pipeline_mode = #tpu.pipeline_mode<synchronous>, transform_indices = @transform_5, window_bounds = array<i64: 4, 36>}, {pipeline_mode = #tpu.pipeline_mode<synchronous>, transform_indices = @transform_6, window_bounds = array<i64: 4, 1>}, {pipeline_mode = #tpu.pipeline_mode<synchronous>, transform_indices = @transform_7, window_bounds = array<i64: 256, 1>}, {pipeline_mode = #tpu.pipeline_mode<synchronous>, transform_indices = @transform_8, window_bounds = array<i64: 1, 256>}, {transform_indices = @transform_9, window_bounds = array<i64: 2>}, {transform_indices = @transform_10, window_bounds = array<i64: 1, 4, 256>}]} {
    %c0 = arith.constant 0 : index
    %c0_0 = arith.constant 0 : index
    %c0_1 = arith.constant 0 : index
    %0 = vector.load %arg1[%c0, %c0_0, %c0_1] : memref<1x4x256xf32, #tpu.memory_space<vmem>>, vector<1x4x256xf32>
    %1 = vector.shape_cast %0 : vector<1x4x256xf32> to vector<4x256xf32>
    %c0_2 = arith.constant 0 : index
    %c0_3 = arith.constant 0 : index
    %2 = vector.load %arg2[%c0_2, %c0_3] : memref<6x256xf32, #tpu.memory_space<vmem>>, vector<6x256xf32>
    %c0_4 = arith.constant 0 : index
    %c0_5 = arith.constant 0 : index
    %3 = vector.load %arg4[%c0_4, %c0_5] : memref<4x1xf32, #tpu.memory_space<vmem>>, vector<4x1xf32>
    %c0_6 = arith.constant 0 : index
    %c0_7 = arith.constant 0 : index
    %4 = vector.load %arg5[%c0_6, %c0_7] : memref<4x1xf32, #tpu.memory_space<vmem>>, vector<4x1xf32>
    %c0_8 = arith.constant 0 : index
    %c0_9 = arith.constant 0 : index
    %5 = vector.load %arg7[%c0_8, %c0_9] : memref<4x1xf32, #tpu.memory_space<vmem>>, vector<4x1xf32>
    %c0_10 = arith.constant 0 : index
    %6 = memref.load %arg10[%c0_10] : memref<2xf32, #tpu.memory_space<smem>>
    %c1 = arith.constant 1 : index
    %7 = memref.load %arg10[%c1] : memref<2xf32, #tpu.memory_space<smem>>
    %8 = vector.extract_strided_slice %2 {offsets = [0, 0], sizes = [1, 256], strides = [1, 1]} : vector<6x256xf32> to vector<1x256xf32>
    %9 = vector.extract_strided_slice %2 {offsets = [3, 0], sizes = [1, 256], strides = [1, 1]} : vector<6x256xf32> to vector<1x256xf32>
    %10 = arith.mulf %8, %9 : vector<1x256xf32>
    %c17_i32 = arith.constant 17 : i32
    %11 = tpu.dynamic_rotate %1 by %c17_i32 dim 1 : vector<4x256xf32>, i32 -> vector<4x256xf32>
    %12 = vector.broadcast %10 : vector<1x256xf32> to vector<4x256xf32>
    %13 = arith.mulf %11, %12 : vector<4x256xf32>
    %c0_11 = arith.constant 0 : index
    %c0_12 = arith.constant 0 : index
    %14 = vector.load %arg12[%c0_11, %c0_12] : memref<36x256xf32, #tpu.memory_space<vmem>>, vector<4x256xf32>
    tpu.vector_store %arg12[%c0_11, %c0_12], %13 {strides = array<i32>} : memref<36x256xf32, #tpu.memory_space<vmem>>, vector<4x256xf32>,
    %15 = vector.extract_strided_slice %2 {offsets = [0, 0], sizes = [1, 256], strides = [1, 1]} : vector<6x256xf32> to vector<1x256xf32>
    %16 = vector.extract_strided_slice %2 {offsets = [4, 0], sizes = [1, 256], strides = [1, 1]} : vector<6x256xf32> to vector<1x256xf32>
    %17 = arith.mulf %15, %16 : vector<1x256xf32>
    %c16_i32 = arith.constant 16 : i32
    %18 = tpu.dynamic_rotate %1 by %c16_i32 dim 1 : vector<4x256xf32>, i32 -> vector<4x256xf32>
    %19 = vector.broadcast %17 : vector<1x256xf32> to vector<4x256xf32>
    %20 = arith.mulf %18, %19 : vector<4x256xf32>
    %c4 = arith.constant 4 : index
    %c0_13 = arith.constant 0 : index
    %21 = vector.load %arg12[%c4, %c0_13] : memref<36x256xf32, #tpu.memory_space<vmem>>, vector<4x256xf32>
    tpu.vector_store %arg12[%c4, %c0_13], %20 {strides = array<i32>} : memref<36x256xf32, #tpu.memory_space<vmem>>, vector<4x256xf32>,
    %22 = vector.extract_strided_slice %2 {offsets = [0, 0], sizes = [1, 256], strides = [1, 1]} : vector<6x256xf32> to vector<1x256xf32>
    %23 = vector.extract_strided_slice %2 {offsets = [5, 0], sizes = [1, 256], strides = [1, 1]} : vector<6x256xf32> to vector<1x256xf32>
    %24 = arith.mulf %22, %23 : vector<1x256xf32>
    %c15_i32 = arith.constant 15 : i32
    %25 = tpu.dynamic_rotate %1 by %c15_i32 dim 1 : vector<4x256xf32>, i32 -> vector<4x256xf32>
    %26 = vector.broadcast %24 : vector<1x256xf32> to vector<4x256xf32>
    %27 = arith.mulf %25, %26 : vector<4x256xf32>
    %c8 = arith.constant 8 : index
    %c0_14 = arith.constant 0 : index
    %28 = vector.load %arg12[%c8, %c0_14] : memref<36x256xf32, #tpu.memory_space<vmem>>, vector<4x256xf32>
    tpu.vector_store %arg12[%c8, %c0_14], %27 {strides = array<i32>} : memref<36x256xf32, #tpu.memory_space<vmem>>, vector<4x256xf32>,
    %29 = vector.extract_strided_slice %2 {offsets = [1, 0], sizes = [1, 256], strides = [1, 1]} : vector<6x256xf32> to vector<1x256xf32>
    %30 = vector.extract_strided_slice %2 {offsets = [3, 0], sizes = [1, 256], strides = [1, 1]} : vector<6x256xf32> to vector<1x256xf32>
    %31 = arith.mulf %29, %30 : vector<1x256xf32>
    %c1_i32 = arith.constant 1 : i32
    %32 = tpu.dynamic_rotate %1 by %c1_i32 dim 1 : vector<4x256xf32>, i32 -> vector<4x256xf32>
    %33 = vector.broadcast %31 : vector<1x256xf32> to vector<4x256xf32>
    %34 = arith.mulf %32, %33 : vector<4x256xf32>
    %c12 = arith.constant 12 : index
    %c0_15 = arith.constant 0 : index
    %35 = vector.load %arg12[%c12, %c0_15] : memref<36x256xf32, #tpu.memory_space<vmem>>, vector<4x256xf32>
    tpu.vector_store %arg12[%c12, %c0_15], %34 {strides = array<i32>} : memref<36x256xf32, #tpu.memory_space<vmem>>, vector<4x256xf32>,
    %c16 = arith.constant 16 : index
    %c0_16 = arith.constant 0 : index
    %36 = vector.load %arg12[%c16, %c0_16] : memref<36x256xf32, #tpu.memory_space<vmem>>, vector<4x256xf32>
    tpu.vector_store %arg12[%c16, %c0_16], %1 {strides = array<i32>} : memref<36x256xf32, #tpu.memory_space<vmem>>, vector<4x256xf32>,
    %37 = vector.extract_strided_slice %2 {offsets = [1, 0], sizes = [1, 256], strides = [1, 1]} : vector<6x256xf32> to vector<1x256xf32>
    %38 = vector.extract_strided_slice %2 {offsets = [5, 0], sizes = [1, 256], strides = [1, 1]} : vector<6x256xf32> to vector<1x256xf32>
    %39 = arith.mulf %37, %38 : vector<1x256xf32>
    %c255_i32 = arith.constant 255 : i32
    %40 = tpu.dynamic_rotate %1 by %c255_i32 dim 1 : vector<4x256xf32>, i32 -> vector<4x256xf32>
    %41 = vector.broadcast %39 : vector<1x256xf32> to vector<4x256xf32>
    %42 = arith.mulf %40, %41 : vector<4x256xf32>
    %c20 = arith.constant 20 : index
    %c0_17 = arith.constant 0 : index
    %43 = vector.load %arg12[%c20, %c0_17] : memref<36x256xf32, #tpu.memory_space<vmem>>, vector<4x256xf32>
    tpu.vector_store %arg12[%c20, %c0_17], %42 {strides = array<i32>} : memref<36x256xf32, #tpu.memory_space<vmem>>, vector<4x256xf32>,
    %44 = vector.extract_strided_slice %2 {offsets = [2, 0], sizes = [1, 256], strides = [1, 1]} : vector<6x256xf32> to vector<1x256xf32>
    %45 = vector.extract_strided_slice %2 {offsets = [3, 0], sizes = [1, 256], strides = [1, 1]} : vector<6x256xf32> to vector<1x256xf32>
    %46 = arith.mulf %44, %45 : vector<1x256xf32>
    %c241_i32 = arith.constant 241 : i32
    %47 = tpu.dynamic_rotate %1 by %c241_i32 dim 1 : vector<4x256xf32>, i32 -> vector<4x256xf32>
    %48 = vector.broadcast %46 : vector<1x256xf32> to vector<4x256xf32>
    %49 = arith.mulf %47, %48 : vector<4x256xf32>
    %c24 = arith.constant 24 : index
    %c0_18 = arith.constant 0 : index
    %50 = vector.load %arg12[%c24, %c0_18] : memref<36x256xf32, #tpu.memory_space<vmem>>, vector<4x256xf32>
    tpu.vector_store %arg12[%c24, %c0_18], %49 {strides = array<i32>} : memref<36x256xf32, #tpu.memory_space<vmem>>, vector<4x256xf32>,
    %51 = vector.extract_strided_slice %2 {offsets = [2, 0], sizes = [1, 256], strides = [1, 1]} : vector<6x256xf32> to vector<1x256xf32>
    %52 = vector.extract_strided_slice %2 {offsets = [4, 0], sizes = [1, 256], strides = [1, 1]} : vector<6x256xf32> to vector<1x256xf32>
    %53 = arith.mulf %51, %52 : vector<1x256xf32>
    %c240_i32 = arith.constant 240 : i32
    %54 = tpu.dynamic_rotate %1 by %c240_i32 dim 1 : vector<4x256xf32>, i32 -> vector<4x256xf32>
    %55 = vector.broadcast %53 : vector<1x256xf32> to vector<4x256xf32>
    %56 = arith.mulf %54, %55 : vector<4x256xf32>
    %c28 = arith.constant 28 : index
    %c0_19 = arith.constant 0 : index
    %57 = vector.load %arg12[%c28, %c0_19] : memref<36x256xf32, #tpu.memory_space<vmem>>, vector<4x256xf32>
    tpu.vector_store %arg12[%c28, %c0_19], %56 {strides = array<i32>} : memref<36x256xf32, #tpu.memory_space<vmem>>, vector<4x256xf32>,
    %58 = vector.extract_strided_slice %2 {offsets = [2, 0], sizes = [1, 256], strides = [1, 1]} : vector<6x256xf32> to vector<1x256xf32>
    %59 = vector.extract_strided_slice %2 {offsets = [5, 0], sizes = [1, 256], strides = [1, 1]} : vector<6x256xf32> to vector<1x256xf32>
    %60 = arith.mulf %58, %59 : vector<1x256xf32>
    %c239_i32 = arith.constant 239 : i32
    %61 = tpu.dynamic_rotate %1 by %c239_i32 dim 1 : vector<4x256xf32>, i32 -> vector<4x256xf32>
    %62 = vector.broadcast %60 : vector<1x256xf32> to vector<4x256xf32>
    %63 = arith.mulf %61, %62 : vector<4x256xf32>
    %c32 = arith.constant 32 : index
    %c0_20 = arith.constant 0 : index
    %64 = vector.load %arg12[%c32, %c0_20] : memref<36x256xf32, #tpu.memory_space<vmem>>, vector<4x256xf32>
    tpu.vector_store %arg12[%c32, %c0_20], %63 {strides = array<i32>} : memref<36x256xf32, #tpu.memory_space<vmem>>, vector<4x256xf32>,
    %c0_21 = arith.constant 0 : index
    %c0_22 = arith.constant 0 : index
    %65 = vector.load %arg3[%c0_21, %c0_22] : memref<8x36xf32, #tpu.memory_space<vmem>>, vector<8x36xf32>
    %c0_23 = arith.constant 0 : index
    %c0_24 = arith.constant 0 : index
    %66 = vector.load %arg12[%c0_23, %c0_24] : memref<36x256xf32, #tpu.memory_space<vmem>>, vector<36x256xf32>
    %cst = arith.constant dense<0.000000e+00> : vector<8x256xf32>
    %67 = tpu.matmul %65, %66, %cst {dimension_numbers = #tpu.dot_dimension_numbers<[1], [0], [0], [1], [0, 0, 1, 1], [], []>} : vector<8x36xf32>, vector<36x256xf32>, vector<8x256xf32> -> vector<8x256xf32>
    %68 = vector.extract_strided_slice %67 {offsets = [0, 0], sizes = [4, 256], strides = [1, 1]} : vector<8x256xf32> to vector<4x256xf32>
    %69 = vector.broadcast %3 : vector<4x1xf32> to vector<4x256xf32>
    %70 = arith.addf %68, %69 : vector<4x256xf32>
    %71 = vector.extract_strided_slice %67 {offsets = [4, 0], sizes = [4, 256], strides = [1, 1]} : vector<8x256xf32> to vector<4x256xf32>
    %72 = vector.broadcast %4 : vector<4x1xf32> to vector<4x256xf32>
    %73 = arith.addf %71, %72 : vector<4x256xf32>
    %cst_25 = arith.constant dense<0.000000e+00> : vector<4xf32>
    %74 = vector.multi_reduction <add>, %70, %cst_25 [1] : vector<4x256xf32> to vector<4xf32>
    %75 = vector.shape_cast %74 : vector<4xf32> to vector<4x1xf32>
    %cst_26 = arith.constant 2.560000e+02 : f32
    %76 = vector.broadcast %cst_26 : f32 to vector<4x1xf32>
    %77 = arith.divf %75, %76 : vector<4x1xf32>
    %78 = vector.broadcast %77 : vector<4x1xf32> to vector<4x256xf32>
    %79 = arith.subf %70, %78 : vector<4x256xf32>
    %80 = arith.mulf %79, %79 : vector<4x256xf32>
    %cst_27 = arith.constant dense<0.000000e+00> : vector<4xf32>
    %81 = vector.multi_reduction <add>, %80, %cst_27 [1] : vector<4x256xf32> to vector<4xf32>
    %82 = vector.shape_cast %81 : vector<4xf32> to vector<4x1xf32>
    %cst_28 = arith.constant 2.560000e+02 : f32
    %83 = vector.broadcast %cst_28 : f32 to vector<4x1xf32>
    %84 = arith.divf %82, %83 : vector<4x1xf32>
    %cst_29 = arith.constant 9.99999974E-6 : f32
    %85 = vector.broadcast %cst_29 : f32 to vector<4x1xf32>
    %86 = arith.addf %84, %85 : vector<4x1xf32>
    %87 = math.rsqrt %86 : vector<4x1xf32>
    %88 = vector.broadcast %87 : vector<4x1xf32> to vector<4x256xf32>
    %89 = arith.mulf %79, %88 : vector<4x256xf32>
    %cst_30 = arith.constant 0.000000e+00 : f32
    %90 = vector.broadcast %cst_30 : f32 to vector<4x256xf32>
    %91 = arith.cmpf oge, %89, %90 : vector<4x256xf32>
    %92 = vector.broadcast %6 : f32 to vector<4x256xf32>
    %93 = arith.mulf %92, %89 : vector<4x256xf32>
    %94 = arith.select %91, %89, %93 : vector<4x256xi1>, vector<4x256xf32>
    %95 = vector.extract_strided_slice %2 {offsets = [0, 0], sizes = [1, 256], strides = [1, 1]} : vector<6x256xf32> to vector<1x256xf32>
    %96 = vector.extract_strided_slice %2 {offsets = [3, 0], sizes = [1, 256], strides = [1, 1]} : vector<6x256xf32> to vector<1x256xf32>
    %97 = arith.mulf %95, %96 : vector<1x256xf32>
    %c17_i32_31 = arith.constant 17 : i32
    %98 = tpu.dynamic_rotate %94 by %c17_i32_31 dim 1 : vector<4x256xf32>, i32 -> vector<4x256xf32>
    %99 = vector.broadcast %97 : vector<1x256xf32> to vector<4x256xf32>
    %100 = arith.mulf %98, %99 : vector<4x256xf32>
    %c0_32 = arith.constant 0 : index
    %c0_33 = arith.constant 0 : index
    %101 = vector.load %arg12[%c0_32, %c0_33] : memref<36x256xf32, #tpu.memory_space<vmem>>, vector<4x256xf32>
    tpu.vector_store %arg12[%c0_32, %c0_33], %100 {strides = array<i32>} : memref<36x256xf32, #tpu.memory_space<vmem>>, vector<4x256xf32>,
    %102 = vector.extract_strided_slice %2 {offsets = [0, 0], sizes = [1, 256], strides = [1, 1]} : vector<6x256xf32> to vector<1x256xf32>
    %103 = vector.extract_strided_slice %2 {offsets = [4, 0], sizes = [1, 256], strides = [1, 1]} : vector<6x256xf32> to vector<1x256xf32>
    %104 = arith.mulf %102, %103 : vector<1x256xf32>
    %c16_i32_34 = arith.constant 16 : i32
    %105 = tpu.dynamic_rotate %94 by %c16_i32_34 dim 1 : vector<4x256xf32>, i32 -> vector<4x256xf32>
    %106 = vector.broadcast %104 : vector<1x256xf32> to vector<4x256xf32>
    %107 = arith.mulf %105, %106 : vector<4x256xf32>
    %c4_35 = arith.constant 4 : index
    %c0_36 = arith.constant 0 : index
    %108 = vector.load %arg12[%c4_35, %c0_36] : memref<36x256xf32, #tpu.memory_space<vmem>>, vector<4x256xf32>
    tpu.vector_store %arg12[%c4_35, %c0_36], %107 {strides = array<i32>} : memref<36x256xf32, #tpu.memory_space<vmem>>, vector<4x256xf32>,
    %109 = vector.extract_strided_slice %2 {offsets = [0, 0], sizes = [1, 256], strides = [1, 1]} : vector<6x256xf32> to vector<1x256xf32>
    %110 = vector.extract_strided_slice %2 {offsets = [5, 0], sizes = [1, 256], strides = [1, 1]} : vector<6x256xf32> to vector<1x256xf32>
    %111 = arith.mulf %109, %110 : vector<1x256xf32>
    %c15_i32_37 = arith.constant 15 : i32
    %112 = tpu.dynamic_rotate %94 by %c15_i32_37 dim 1 : vector<4x256xf32>, i32 -> vector<4x256xf32>
    %113 = vector.broadcast %111 : vector<1x256xf32> to vector<4x256xf32>
    %114 = arith.mulf %112, %113 : vector<4x256xf32>
    %c8_38 = arith.constant 8 : index
    %c0_39 = arith.constant 0 : index
    %115 = vector.load %arg12[%c8_38, %c0_39] : memref<36x256xf32, #tpu.memory_space<vmem>>, vector<4x256xf32>
    tpu.vector_store %arg12[%c8_38, %c0_39], %114 {strides = array<i32>} : memref<36x256xf32, #tpu.memory_space<vmem>>, vector<4x256xf32>,
    %116 = vector.extract_strided_slice %2 {offsets = [1, 0], sizes = [1, 256], strides = [1, 1]} : vector<6x256xf32> to vector<1x256xf32>
    %117 = vector.extract_strided_slice %2 {offsets = [3, 0], sizes = [1, 256], strides = [1, 1]} : vector<6x256xf32> to vector<1x256xf32>
    %118 = arith.mulf %116, %117 : vector<1x256xf32>
    %c1_i32_40 = arith.constant 1 : i32
    %119 = tpu.dynamic_rotate %94 by %c1_i32_40 dim 1 : vector<4x256xf32>, i32 -> vector<4x256xf32>
    %120 = vector.broadcast %118 : vector<1x256xf32> to vector<4x256xf32>
    %121 = arith.mulf %119, %120 : vector<4x256xf32>
    %c12_41 = arith.constant 12 : index
    %c0_42 = arith.constant 0 : index
    %122 = vector.load %arg12[%c12_41, %c0_42] : memref<36x256xf32, #tpu.memory_space<vmem>>, vector<4x256xf32>
    tpu.vector_store %arg12[%c12_41, %c0_42], %121 {strides = array<i32>} : memref<36x256xf32, #tpu.memory_space<vmem>>, vector<4x256xf32>,
    %c16_43 = arith.constant 16 : index
    %c0_44 = arith.constant 0 : index
    %123 = vector.load %arg12[%c16_43, %c0_44] : memref<36x256xf32, #tpu.memory_space<vmem>>, vector<4x256xf32>
    tpu.vector_store %arg12[%c16_43, %c0_44], %94 {strides = array<i32>} : memref<36x256xf32, #tpu.memory_space<vmem>>, vector<4x256xf32>,
    %124 = vector.extract_strided_slice %2 {offsets = [1, 0], sizes = [1, 256], strides = [1, 1]} : vector<6x256xf32> to vector<1x256xf32>
    %125 = vector.extract_strided_slice %2 {offsets = [5, 0], sizes = [1, 256], strides = [1, 1]} : vector<6x256xf32> to vector<1x256xf32>
    %126 = arith.mulf %124, %125 : vector<1x256xf32>
    %c255_i32_45 = arith.constant 255 : i32
    %127 = tpu.dynamic_rotate %94 by %c255_i32_45 dim 1 : vector<4x256xf32>, i32 -> vector<4x256xf32>
    %128 = vector.broadcast %126 : vector<1x256xf32> to vector<4x256xf32>
    %129 = arith.mulf %127, %128 : vector<4x256xf32>
    %c20_46 = arith.constant 20 : index
    %c0_47 = arith.constant 0 : index
    %130 = vector.load %arg12[%c20_46, %c0_47] : memref<36x256xf32, #tpu.memory_space<vmem>>, vector<4x256xf32>
    tpu.vector_store %arg12[%c20_46, %c0_47], %129 {strides = array<i32>} : memref<36x256xf32, #tpu.memory_space<vmem>>, vector<4x256xf32>,
    %131 = vector.extract_strided_slice %2 {offsets = [2, 0], sizes = [1, 256], strides = [1, 1]} : vector<6x256xf32> to vector<1x256xf32>
    %132 = vector.extract_strided_slice %2 {offsets = [3, 0], sizes = [1, 256], strides = [1, 1]} : vector<6x256xf32> to vector<1x256xf32>
    %133 = arith.mulf %131, %132 : vector<1x256xf32>
    %c241_i32_48 = arith.constant 241 : i32
    %134 = tpu.dynamic_rotate %94 by %c241_i32_48 dim 1 : vector<4x256xf32>, i32 -> vector<4x256xf32>
    %135 = vector.broadcast %133 : vector<1x256xf32> to vector<4x256xf32>
    %136 = arith.mulf %134, %135 : vector<4x256xf32>
    %c24_49 = arith.constant 24 : index
    %c0_50 = arith.constant 0 : index
    %137 = vector.load %arg12[%c24_49, %c0_50] : memref<36x256xf32, #tpu.memory_space<vmem>>, vector<4x256xf32>
    tpu.vector_store %arg12[%c24_49, %c0_50], %136 {strides = array<i32>} : memref<36x256xf32, #tpu.memory_space<vmem>>, vector<4x256xf32>,
    %138 = vector.extract_strided_slice %2 {offsets = [2, 0], sizes = [1, 256], strides = [1, 1]} : vector<6x256xf32> to vector<1x256xf32>
    %139 = vector.extract_strided_slice %2 {offsets = [4, 0], sizes = [1, 256], strides = [1, 1]} : vector<6x256xf32> to vector<1x256xf32>
    %140 = arith.mulf %138, %139 : vector<1x256xf32>
    %c240_i32_51 = arith.constant 240 : i32
    %141 = tpu.dynamic_rotate %94 by %c240_i32_51 dim 1 : vector<4x256xf32>, i32 -> vector<4x256xf32>
    %142 = vector.broadcast %140 : vector<1x256xf32> to vector<4x256xf32>
    %143 = arith.mulf %141, %142 : vector<4x256xf32>
    %c28_52 = arith.constant 28 : index
    %c0_53 = arith.constant 0 : index
    %144 = vector.load %arg12[%c28_52, %c0_53] : memref<36x256xf32, #tpu.memory_space<vmem>>, vector<4x256xf32>
    tpu.vector_store %arg12[%c28_52, %c0_53], %143 {strides = array<i32>} : memref<36x256xf32, #tpu.memory_space<vmem>>, vector<4x256xf32>,
    %145 = vector.extract_strided_slice %2 {offsets = [2, 0], sizes = [1, 256], strides = [1, 1]} : vector<6x256xf32> to vector<1x256xf32>
    %146 = vector.extract_strided_slice %2 {offsets = [5, 0], sizes = [1, 256], strides = [1, 1]} : vector<6x256xf32> to vector<1x256xf32>
    %147 = arith.mulf %145, %146 : vector<1x256xf32>
    %c239_i32_54 = arith.constant 239 : i32
    %148 = tpu.dynamic_rotate %94 by %c239_i32_54 dim 1 : vector<4x256xf32>, i32 -> vector<4x256xf32>
    %149 = vector.broadcast %147 : vector<1x256xf32> to vector<4x256xf32>
    %150 = arith.mulf %148, %149 : vector<4x256xf32>
    %c32_55 = arith.constant 32 : index
    %c0_56 = arith.constant 0 : index
    %151 = vector.load %arg12[%c32_55, %c0_56] : memref<36x256xf32, #tpu.memory_space<vmem>>, vector<4x256xf32>
    tpu.vector_store %arg12[%c32_55, %c0_56], %150 {strides = array<i32>} : memref<36x256xf32, #tpu.memory_space<vmem>>, vector<4x256xf32>,
    %c0_57 = arith.constant 0 : index
    %c0_58 = arith.constant 0 : index
    %152 = vector.load %arg6[%c0_57, %c0_58] : memref<4x36xf32, #tpu.memory_space<vmem>>, vector<4x36xf32>
    %c0_59 = arith.constant 0 : index
    %c0_60 = arith.constant 0 : index
    %153 = vector.load %arg12[%c0_59, %c0_60] : memref<36x256xf32, #tpu.memory_space<vmem>>, vector<36x256xf32>
    %cst_61 = arith.constant dense<0.000000e+00> : vector<4x256xf32>
    %154 = tpu.matmul %152, %153, %cst_61 {dimension_numbers = #tpu.dot_dimension_numbers<[1], [0], [0], [1], [0, 0, 1, 1], [], []>} : vector<4x36xf32>, vector<36x256xf32>, vector<4x256xf32> -> vector<4x256xf32>
    %155 = vector.broadcast %5 : vector<4x1xf32> to vector<4x256xf32>
    %156 = arith.addf %154, %155 : vector<4x256xf32>
    %cst_62 = arith.constant dense<0.000000e+00> : vector<4xf32>
    %157 = vector.multi_reduction <add>, %156, %cst_62 [1] : vector<4x256xf32> to vector<4xf32>
    %158 = vector.shape_cast %157 : vector<4xf32> to vector<4x1xf32>
    %cst_63 = arith.constant 2.560000e+02 : f32
    %159 = vector.broadcast %cst_63 : f32 to vector<4x1xf32>
    %160 = arith.divf %158, %159 : vector<4x1xf32>
    %161 = vector.broadcast %160 : vector<4x1xf32> to vector<4x256xf32>
    %162 = arith.subf %156, %161 : vector<4x256xf32>
    %163 = arith.mulf %162, %162 : vector<4x256xf32>
    %cst_64 = arith.constant dense<0.000000e+00> : vector<4xf32>
    %164 = vector.multi_reduction <add>, %163, %cst_64 [1] : vector<4x256xf32> to vector<4xf32>
    %165 = vector.shape_cast %164 : vector<4xf32> to vector<4x1xf32>
    %cst_65 = arith.constant 2.560000e+02 : f32
    %166 = vector.broadcast %cst_65 : f32 to vector<4x1xf32>
    %167 = arith.divf %165, %166 : vector<4x1xf32>
    %cst_66 = arith.constant 9.99999974E-6 : f32
    %168 = vector.broadcast %cst_66 : f32 to vector<4x1xf32>
    %169 = arith.addf %167, %168 : vector<4x1xf32>
    %170 = math.rsqrt %169 : vector<4x1xf32>
    %171 = vector.broadcast %170 : vector<4x1xf32> to vector<4x256xf32>
    %172 = arith.mulf %162, %171 : vector<4x256xf32>
    %cst_67 = arith.constant 0.000000e+00 : f32
    %173 = vector.broadcast %cst_67 : f32 to vector<4x256xf32>
    %174 = arith.cmpf oge, %172, %173 : vector<4x256xf32>
    %175 = vector.broadcast %7 : f32 to vector<4x256xf32>
    %176 = arith.mulf %175, %172 : vector<4x256xf32>
    %177 = arith.select %174, %172, %176 : vector<4x256xi1>, vector<4x256xf32>
    %178 = arith.addf %73, %177 : vector<4x256xf32>
    %c0_68 = arith.constant 0 : index
    %c0_69 = arith.constant 0 : index
    %c0_70 = arith.constant 0 : index
    %179 = vector.load %arg11[%c0_68, %c0_69, %c0_70] : memref<1x4x256xf32, #tpu.memory_space<vmem>>, vector<1x4x256xf32>
    %180 = vector.shape_cast %179 : vector<1x4x256xf32> to vector<4x256xf32>
    %181 = vector.shape_cast %178 : vector<4x256xf32> to vector<1x4x256xf32>
    tpu.vector_store %arg11[%c0_68, %c0_69, %c0_70], %181 {strides = array<i32>} : memref<1x4x256xf32, #tpu.memory_space<vmem>>, vector<1x4x256xf32>,
    return
  }
  func.func @transform_0(%arg0: i32) -> (i32, i32, i32) {
    %c0_i32 = arith.constant 0 : i32
    %c0_i32_0 = arith.constant 0 : i32
    %c0_i32_1 = arith.constant 0 : i32
    return %arg0, %c0_i32, %c0_i32_0 : i32, i32, i32
  }
  func.func @transform_1(%arg0: i32) -> (i32, i32) {
    %c0_i32 = arith.constant 0 : i32
    %c0_i32_0 = arith.constant 0 : i32
    %c0_i32_1 = arith.constant 0 : i32
    return %c0_i32, %c0_i32_0 : i32, i32
  }
  func.func @transform_2(%arg0: i32) -> (i32, i32) {
    %c0_i32 = arith.constant 0 : i32
    %c0_i32_0 = arith.constant 0 : i32
    %c0_i32_1 = arith.constant 0 : i32
    return %c0_i32, %c0_i32_0 : i32, i32
  }
  func.func @transform_3(%arg0: i32) -> (i32, i32) {
    %c0_i32 = arith.constant 0 : i32
    %c0_i32_0 = arith.constant 0 : i32
    %c0_i32_1 = arith.constant 0 : i32
    return %c0_i32, %c0_i32_0 : i32, i32
  }
  func.func @transform_4(%arg0: i32) -> (i32, i32) {
    %c0_i32 = arith.constant 0 : i32
    %c0_i32_0 = arith.constant 0 : i32
    %c0_i32_1 = arith.constant 0 : i32
    return %c0_i32, %c0_i32_0 : i32, i32
  }
  func.func @transform_5(%arg0: i32) -> (i32, i32) {
    %c0_i32 = arith.constant 0 : i32
    %c0_i32_0 = arith.constant 0 : i32
    %c0_i32_1 = arith.constant 0 : i32
    return %c0_i32, %c0_i32_0 : i32, i32
  }
  func.func @transform_6(%arg0: i32) -> (i32, i32) {
    %c0_i32 = arith.constant 0 : i32
    %c0_i32_0 = arith.constant 0 : i32
    %c0_i32_1 = arith.constant 0 : i32
    return %c0_i32, %c0_i32_0 : i32, i32
  }
  func.func @transform_7(%arg0: i32) -> (i32, i32) {
    %c0_i32 = arith.constant 0 : i32
    %c0_i32_0 = arith.constant 0 : i32
    %c0_i32_1 = arith.constant 0 : i32
    return %c0_i32, %c0_i32_0 : i32, i32
  }
  func.func @transform_8(%arg0: i32) -> (i32, i32) {
    %c0_i32 = arith.constant 0 : i32
    %c0_i32_0 = arith.constant 0 : i32
    %c0_i32_1 = arith.constant 0 : i32
    return %c0_i32, %c0_i32_0 : i32, i32
  }
  func.func @transform_9(%arg0: i32) -> i32 {
    %c0_i32 = arith.constant 0 : i32
    %c0_i32_0 = arith.constant 0 : i32
    return %c0_i32 : i32
  }
  func.func @transform_10(%arg0: i32) -> (i32, i32, i32) {
    %c0_i32 = arith.constant 0 : i32
    %c0_i32_0 = arith.constant 0 : i32
    %c0_i32_1 = arith.constant 0 : i32
    return %arg0, %c0_i32, %c0_i32_0 : i32, i32, i32
  }
}

</mosaic_0001>

<bundles_post_ra>
// kernel: tpu_custom_call.1
= control target key start
LH: loop header
LB: loop body
LE: loop exit
PB: predicated region body
PF: predicated region fallthrough
CT: control target
= control target key end

     0   :  { %15 = vsyncpa [#allocation5], 0  ;;  %s1654_s0 = inlined_call_operand.vmem [shape: f32[2,4,256], index: 0, kind: input, shape index: {}]   ;;  %s1655_s1 = inlined_call_operand.vmem [shape: f32[6,256], index: 1, kind: input, shape index: {}]   ;;  %s1656_s2 = inlined_call_operand.vmem [shape: f32[8,36], index: 2, kind: input, shape index: {}]   ;;  %s1657_s3 = inlined_call_operand.vmem [shape: f32[4,1], index: 3, kind: input, shape index: {}]   ;;  %s1658_s4 = inlined_call_operand.vmem [shape: f32[4,1], index: 4, kind: input, shape index: {}]   ;;  %s1659_s5 = inlined_call_operand.vmem [shape: f32[4,36], index: 5, kind: input, shape index: {}]   ;;  %s1660_s6 = inlined_call_operand.vmem [shape: f32[4,1], index: 6, kind: input, shape index: {}]   ;;  %s1661_s7 = inlined_call_operand.vmem [shape: f32[256,1], index: 7, kind: input, shape index: {}]   ;;  %s1662_s8 = inlined_call_operand.vmem [shape: f32[1,256], index: 8, kind: input, shape index: {}]   ;;  %s1663_s9 = inlined_call_operand.vmem [shape: f32[2], index: 9, kind: input, shape index: {}]   ;;  %s1664_s10 = inlined_call_operand.hbm [shape: f32[2,4,256], index: 10, kind: output, shape index: {}]  }
   0x1   :  { %16 = vsyncpa [#allocation4], 0 }
   0x2   :  { %18 = vsyncpa [#allocation4 + $0x1], 0  ;;  %s1296_s13 = smov 0   ;;  %s1298_s14 = smov 0  }
   0x3   :  { %s1300_s15 = smov 0   ;;  %s1302_s16 = smov 0  }
   0x4 LB: > { %s1317_s7 = sadd.s32 4294967295, %s1227_s16   ;;  %s1059_s8 = sadd.s32 4294967294, %s1227_s16   ;;  %s1227_s16 = sphi %s1302_s16, %s1674_s16   ;;  %s1223_s15 = sphi %s1300_s15, %s1673_s15   ;;  %s1219_s14 = sphi %s1298_s14, %s1672_s14   ;;  %s1215_s13 = sphi %s1296_s13, %s1671_s13  }
   0x5   : > { %s1321_s17 = sadd.s32 1, %s1227_s16   ;;  %s246_s18 = sadd.s32 1, %s1223_s15 }
   0x6   : > { %s243_s19 = ssub.s32 %s1227_s16, %s1321_s17  ;;  %p256_p0 = scmp.ne.s32.totalorder %s1223_s15, %s1219_s14 }
   0x7   : > { %p244_p1 = scmp.eq.s32.totalorder %s243_s19, 0  ;;  %p257_p2 = scmp.eq.s32.totalorder %s1317_s7, 1 }
   0x8   : > { %p262_p3 = scmp.ne.s32.totalorder %s1219_s14, %s1215_s13  ;;  %p263_p4 = scmp.eq.s32.totalorder %s1059_s8, 1 }
   0x9   : > { %s1332_s20 = scalar_select %p244_p1, %s1223_s15, %s246_s18  }
   0xa   : > { %p1334_p5 = por %p257_p2, %p256_p0  ;;  %p1338_p6 = por %p263_p4, %p262_p3 }
   0xb   : > { %p1060_p7 = scmp.ge.s32.totalorder %s1227_s16, 1  ;;  %p270_p8 = scmp.lt.s32.totalorder %s1227_s16, 3 }
   0xc   : > { %p1096_p9 = scmp.eq.s32.totalorder %s1317_s7, 0  ;;  %s307_s26 = sshll.u32 %s1663_s9, 4  ;;  %s308_s26 = int_to_ptr.vmem [resolvable:$true] %s307_s26 }
   0xd   : > { %p1345_p10 = pnand %p1060_p7, %p270_p8  ;;  %s1148_s27 = scalar_lea.vmem %s308_s26, 16 }
   0xe   : > { %p1149_p13 = scmp.ne.s32.totalorder %s308_s26, %s1148_s27  ;;  %p1156_p3 = scmp.lt.s32.totalorder %s308_s26, %s308_s26 }
   0xf   : > { %p1088_p11 = pneg %p1345_p10  ;;  %p1157_p4 = scmp.lt.s32.totalorder %s1148_s27, %s1148_s27 }
  0x11   : > { %p1089_p12 = pnand %p1096_p9, %p1088_p11  ;;  %p1158_p7 = por %p1157_p4, %p1156_p3 }
  0x13   : > { %p1150_p0 = pneg %p1089_p12 }
  0x15   : > { %p1151_p1 = pnand %p1150_p0, %p1149_p13 }
  0x17   : > { %p1152_p2 = pneg %p1151_p1 }
  0x19   : > { %p1159_p8 = pnand %p1158_p7, %p1152_p2 }
  0x1b   : > { %1162 = shalt.err (!%p1159_p8)
}
  0x1c   : > { %s1229_s28 = smov [#allocation3]   ;;  %328 = sbr.rel (%p1345_p10) target bundleno = 1394 (0x572), region = 60 }
  0x1d   : > { %1091 = dma.vmem_to_smem (!%p1089_p12), %s308_s26, 16, %s1229_s28, [#allocation5]  }
  0x21   : > { %1206 = dma.done.wait (%p1096_p9), [#allocation5], 16  }
  0x22   : > { %1208 = vsyncadd (%p1096_p9), [#allocation5], 4294967280 }
  0x23   : > { %334 = sfence }
  0x24   : > { %p367_p11 = scmp.lt.s32.totalorder %s1317_s7, 1  ;;  %s1230_s18 = smov 111   ;;  %v1237_v2 = vmov 0.0   ;;  %v1239_v3 = vmov 0   ;;  %v375_v4 = vld [vmem:[%s1657_s3] sm:$0xf]  ;;  %v395_v5 = vlaneseq }
  0x25   : > { %s1231_s19 = smov 112   ;;  %s1232_s23 = smov 127   ;;  %681 = vmatprep.mubr.f32.mxu0 %v1237_v2  ;;  %926 = vmatprep.mubr.f32.mxu1 %v1237_v2  ;;  %v1389_v6 = vld [vmem:[%s1655_s1] sm:$0x3f]  ;;  %v1394_v7 = vld [vmem:[%s1655_s1 + $0x8] sm:$0x3f] }
  0x26   : > { %s368_s29 = scalar_select %p367_p11, %s1317_s7, 1  ;;  %1142 = vset.pattern.permute.xlu0 %v1239_v3  ;;  %v382_v8 = vrot.slane %v1389_v6, 3  ;;  %v383_v9 = vrot.slane %v1394_v7, 3  ;;  %v401_v10 = vshrl.u32 %v395_v5, 7  ;;  %v1398_v11 = vand.u32 127, %v395_v5 }
  0x27   : > { %s1233_s24 = smov 113   ;;  %s1234_s25 = smov 1   ;;  %v412_v12 = vrot.slane %v1389_v6, 4  ;;  %v413_v13 = vrot.slane %v1394_v7, 4  ;;  %v468_v14 = vrot.slane %v1389_v6, 2  ;;  %v469_v18 = vrot.slane %v1394_v7, 2 }
  0x28   : > { %s1080_s30 = sshll.u32 %s368_s29, 3  ;;  %s1235_s26 = smov 16   ;;  %v1404_v15 = vmul.f32 %v382_v8, %v1389_v6  ;;  %v1407_v16 = vmul.f32 %v383_v9, %v1394_v7  ;;  %v541_v17 = vsub.s32 2, %v401_v10  ;;  %v526_v21 = vrot.slane %v1389_v6, 1 }
  0x29   : > { %s371_s8 = scalar_lea.vmem %s1654_s0, %s1080_s30  ;;  %s1665_s27 = smov 15   ;;  %v527_v22 = vrot.slane %v1394_v7, 1  ;;  %vm580_vm0 = vcmp.lt.s32.totalorder %v1398_v11, 111  ;;  %v1414_v23 = vmul.f32 %v412_v12, %v1389_v6  ;;  %v1417_v24 = vmul.f32 %v413_v13, %v1394_v7 }
  0x2a   : > { %v372_v0 = vld [vmem:[%s371_s8] sm:$0xff]  ;;  %s1238_s28 = smov 17   ;;  %v483_v25 = vsub.s32 1, %v401_v10  ;;  %v1420_v26 = vrot.slane %v1404_v15, %v541_v17  ;;  %v1423_v27 = vrot.slane %v1407_v16, %v541_v17  ;;  %v472_v28 = vmul.f32 %v468_v14, %v1389_v6  ;;  %s378_s30 = sld [smem:[#allocation3]] }
  0x2b   : > { %576 = vrot.lane.b32.xlu1 %v372_v0, %s1230_s18  ;;  %499 = vst [vmem:[#allocation2 + $0x48] sm:$0xf] %v372_v0  ;;  %551 = vrot.lane.b32.xlu0 %v372_v0, %s1231_s19  ;;  %v389_v1 = vcombine.high %v372_v0, %v372_v0  ;;  %v473_v29 = vmul.f32 %v469_v18, %v1394_v7  ;;  %vm505_vm1 = vcmp.lt.s32.totalorder %v1398_v11, 127  ;;  %vm555_vm2 = vcmp.lt.s32.totalorder %v1398_v11, 112  ;;  %s1670_s11 = smov 15  }
  0x2c   : > { %v530_v32 = vmul.f32 %v526_v21, %v1389_v6  ;;  %v531_v33 = vmul.f32 %v527_v22, %v1394_v7  ;;  %v1436_v36 = vrot.slane %v1414_v23, %v483_v25  ;;  %v1439_v37 = vrot.slane %v1417_v24, %v483_v25 }
  0x2d   : > { %500 = vst [vmem:[#allocation2 + $0x28] sm:$0xf] %v389_v1  ;;  %v1443_v40 = vrot.slane %v472_v28, %v541_v17  ;;  %v1445_v41 = vrot.slane %v473_v29, %v541_v17  ;;  %vm536_vm3 = vcmp.lt.s32.totalorder %v1398_v11, 113  ;;  %vm610_vm4 = vcmask 1043456  }
  0x2e   : > { %v1448_v44 = vrot.slane %v530_v32, %v541_v17  ;;  %v1450_v45 = vrot.slane %v531_v33, %v541_v17  ;;  %vm478_vm5 = vcmp.lt.s32.totalorder %v1398_v11, 1  ;;  %v1465_v54 = vrot.slane %v472_v28, %v483_v25 }
  0x2f   : > { %501 = vrot.lane.b32.xlu0 %v372_v0, %s1232_s23  ;;  %578 = vrot.lane.b32.xlu1 %v389_v1, %s1230_s18  ;;  %v1471_v63 = vrot.slane %v473_v29, %v483_v25  ;;  %v443_v3 = vrot.slane %v1389_v6, 5  ;;  %vm422_vm6 = vcmp.lt.s32.totalorder %v1398_v11, 16  ;;  %vm453_vm7 = vcmp.lt.s32.totalorder %v1398_v11, 15 }
  0x30   : > { %vm397_vm8 = vcmp.lt.s32.totalorder %v1398_v11, 17  ;;  %vm606_vm9 = vcmask 293888  }
  0x33   : > { %503 = vrot.lane.b32.xlu1 %v389_v1, %s1232_s23  ;;  %553 = vrot.lane.b32.xlu0 %v389_v1, %s1231_s19 }
  0x37   : > { %534 = vrot.lane.b32.xlu1 %v389_v1, %s1233_s24  ;;  %532 = vrot.lane.b32.xlu0 %v372_v0, %s1233_s24 }
  0x3b   : > { %476 = vrot.lane.b32.xlu1 %v389_v1, %s1234_s25  ;;  %474 = vrot.lane.b32.xlu0 %v372_v0, %s1234_s25 }
  0x3f   : > { %420 = vrot.lane.b32.xlu1 %v389_v1, %s1235_s26  ;;  %418 = vrot.lane.b32.xlu0 %v372_v0, %s1235_s26 }
  0x43   : > { %451 = vrot.lane.b32.xlu1 %v389_v1, %s1665_s27  ;;  %449 = vrot.lane.b32.xlu0 %v372_v0, %s1665_s27  ;;  %s1081_s27 = sshll.u32 %s1317_s7, 7 }
  0x44   : > { %s986_s12 = scalar_lea.hbm %s1664_s10, %s1081_s27 }
  0x47   : > { %393 = vrot.lane.b32.xlu1 %v389_v1, %s1238_s28  ;;  %391 = vrot.lane.b32.xlu0 %v372_v0, %s1238_s28  ;;  %v402_v0 = vsub.s32 0, %v401_v10 }
  0x49   : > { %v1485_v14 = vrot.slane %v1414_v23, %v402_v0  ;;  %v1488_v17 = vrot.slane %v1417_v24, %v402_v0 }
  0x4b   : > { %690 = vperm.xlu0 %1142, %v375_v4   ;;  %v444_v4 = vrot.slane %v1394_v7, 5 }
  0x4d   : > { %v448_v21 = vmul.f32 %v444_v4, %v1394_v7 }
  0x4f   : > { %v1503_v7 = vrot.slane %v448_v21, %v402_v0 }
  0x9d   : > { %v577_v19 = vpop.permute.xlu1 %576  ;;  %v552_v20 = vpop.permute.xlu0 %551 }
  0xa1   : > { %v502_v30 = vpop.permute.xlu0 %501  ;;  %v579_v31 = vpop.permute.xlu1 %578 }
  0xa2   : > { %v581_v34 = vsel %vm580_vm0, %v577_v19, %v579_v31  ;;  %v582_v35 = vsel %vm580_vm0, %v579_v31, %v577_v19 }
  0xa3   : > { %v591_v38 = vmul.f32 %v1420_v26, %v581_v34  ;;  %v592_v39 = vmul.f32 %v1423_v27, %v582_v35 }
  0xa5   : > { %593 = vst [vmem:[#allocation2 + $0x40] sm:$0xf] %v591_v38  ;;  %594 = vst [vmem:[#allocation2 + $0x38] sm:$0xf] %v592_v39  ;;  %v504_v42 = vpop.permute.xlu1 %503  ;;  %v554_v43 = vpop.permute.xlu0 %553 }
  0xa6   : > { %v506_v46 = vsel %vm505_vm1, %v502_v30, %v504_v42  ;;  %v507_v47 = vsel %vm505_vm1, %v504_v42, %v502_v30  ;;  %v556_v48 = vsel %vm555_vm2, %v552_v20, %v554_v43  ;;  %v557_v49 = vsel %vm555_vm2, %v554_v43, %v552_v20 }
  0xa7   : > { %v516_v50 = vmul.f32 %v1436_v36, %v506_v46  ;;  %v517_v51 = vmul.f32 %v1439_v37, %v507_v47  ;;  %v566_v52 = vmul.f32 %v1443_v40, %v556_v48  ;;  %v567_v53 = vmul.f32 %v1445_v41, %v557_v49 }
  0xa8   : > { %v447_v20 = vmul.f32 %v443_v3, %v1389_v6 }
  0xa9   : > { %v520_v55 = vrot.slane %v516_v50, 4  ;;  %v521_v56 = vrot.slane %v517_v51, 4  ;;  %v570_v57 = vrot.slane %v566_v52, 4  ;;  %v571_v58 = vrot.slane %v567_v53, 4  ;;  %v535_v59 = vpop.permute.xlu1 %534  ;;  %v533_v60 = vpop.permute.xlu0 %532 }
  0xaa   : > { %v537_v61 = vsel %vm536_vm3, %v533_v60, %v535_v59  ;;  %v538_v62 = vsel %vm536_vm3, %v535_v59, %v533_v60  ;;  %v1501_v31 = vrot.slane %v447_v20, %v402_v0  ;;  %v1513_v50 = vrot.slane %v1404_v15, %v402_v0 }
  0xab   : > { %524 = vst [vmem:[#allocation2 + $0x48] sm:$0xf0] %v520_v55  ;;  %525 = vst [vmem:[#allocation2 + $0x28] sm:$0xf0] %v521_v56  ;;  %v547_v1 = vmul.f32 %v1448_v44, %v537_v61  ;;  %v548_v2 = vmul.f32 %v1450_v45, %v538_v62  ;;  %v1516_v51 = vrot.slane %v1407_v16, %v402_v0  ;;  %v595_v61 = vld [vmem:[%s1656_s2] sm:$0xff] }
  0xac   : > { %574 = vst [vmem:[#allocation2 + $0x8] sm:$0xf0] %v570_v57  ;;  %575 = vst [vmem:[#allocation2 + $0x20] sm:$0xf0] %v571_v58  ;;  %v605_v5 = vld [vmem:[#allocation2 + $0x38] sm:$0xf] }
  0xad   : > { %v604_v8 = vld [vmem:[#allocation2 + $0x40] sm:$0xf]  ;;  %549 = vst [vmem:[#allocation2 + $0x8] sm:$0xf] %v547_v1  ;;  %550 = vst [vmem:[#allocation2 + $0x20] sm:$0xf] %v548_v2  ;;  %1069 = vmatprep.subr.msk.mxu0 %vm610_vm4, %v605_v5  ;;  %v477_v9 = vpop.permute.xlu1 %476  ;;  %v475_v10 = vpop.permute.xlu0 %474 }
  0xae   : > { %v479_v12 = vsel %vm478_vm5, %v475_v10, %v477_v9  ;;  %v480_v13 = vsel %vm478_vm5, %v477_v9, %v475_v10  ;;  %1070 = vmatpush1.msk.msra.mxu0 %vm610_vm4, %v604_v8 }
  0xaf   : > { %v489_v18 = vmul.f32 %v1465_v54, %v480_v13  ;;  %v490_v19 = vmul.f32 %v1471_v63, %v479_v12 }
  0xb1   : > { %v493_v22 = vrot.slane %v489_v18, 4  ;;  %v494_v25 = vrot.slane %v490_v19, 4  ;;  %v421_v28 = vpop.permute.xlu1 %420  ;;  %v419_v29 = vpop.permute.xlu0 %418 }
  0xb2   : > { %v423_v30 = vsel %vm422_vm6, %v419_v29, %v421_v28  ;;  %v424_v23 = vsel %vm422_vm6, %v421_v28, %v419_v29  ;;  %v601_v46 = vld [vmem:[#allocation2 + $0x28] sm:$0xff] }
  0xb3   : > { %497 = vst [vmem:[#allocation2 + $0x18] sm:$0xf0] %v493_v22  ;;  %498 = vst [vmem:[#allocation2 + $0x10] sm:$0xf0] %v494_v25  ;;  %v433_v24 = vmul.f32 %v1485_v14, %v424_v23  ;;  %v434_v6 = vmul.f32 %v1488_v17, %v423_v30  ;;  %v600_v49 = vld [vmem:[#allocation2 + $0x48] sm:$0xff]  ;;  %v726_v23 = vstv %s378_s30 }
  0xb4   : > { %v603_v32 = vld [vmem:[#allocation2 + $0x20] sm:$0xff]  ;;  %v602_v33 = vld [vmem:[#allocation2 + $0x8] sm:$0xff] }
  0xb5   : > { %v437_v34 = vrot.slane %v433_v24, 4  ;;  %v438_v35 = vrot.slane %v434_v6, 4  ;;  %v452_v38 = vpop.permute.xlu1 %451  ;;  %641 = vmatprep.subr.mxu0 %v603_v32  ;;  %v450_v39 = vpop.permute.xlu0 %449 }
  0xb6   : > { %v454_v42 = vsel %vm453_vm7, %v450_v39, %v452_v38  ;;  %v455_v43 = vsel %vm453_vm7, %v452_v38, %v450_v39  ;;  %642 = vmatpush1.msra.mxu0 %v602_v33  ;;  %v377_v38 = vld [vmem:[%s1660_s6] sm:$0xf] }
  0xb7   : > { %441 = vst [vmem:[#allocation2 + $0x30] sm:$0xf0] %v437_v34  ;;  %442 = vst [vmem:[#allocation2] sm:$0xf0] %v438_v35  ;;  %v464_v47 = vmul.f32 %v1501_v31, %v455_v43  ;;  %v465_v48 = vmul.f32 %v1503_v7, %v454_v42  ;;  %643 = vmatprep.subr.mxu0 %v601_v46 }
  0xb8   : > { %644 = vmatpush1.msra.mxu0 %v600_v49 }
  0xb9   : > { %466 = vst [vmem:[#allocation2 + $0x18] sm:$0xf] %v464_v47  ;;  %467 = vst [vmem:[#allocation2 + $0x10] sm:$0xf] %v465_v48  ;;  %v394_v52 = vpop.permute.xlu1 %393  ;;  %v392_v53 = vpop.permute.xlu0 %391 }
  0xba   : > { %v398_v55 = vsel %vm397_vm8, %v392_v53, %v394_v52  ;;  %v399_v56 = vsel %vm397_vm8, %v394_v52, %v392_v53 }
  0xbb   : > { %v408_v57 = vmul.f32 %v1513_v50, %v399_v56  ;;  %v409_v58 = vmul.f32 %v1516_v51, %v398_v55 }
  0xbd   : > { %410 = vst [vmem:[#allocation2 + $0x30] sm:$0xf] %v408_v57  ;;  %411 = vst [vmem:[#allocation2] sm:$0xf] %v409_v58 }
  0xc0   : > { %v599_v15 = vld [vmem:[#allocation2 + $0x10] sm:$0xff]  ;;  %v598_v16 = vld [vmem:[#allocation2 + $0x18] sm:$0xff] }
  0xc1   : > { %645 = vmatprep.subr.mxu0 %v599_v15 }
  0xc2   : > { %646 = vmatpush1.msra.mxu0 %v598_v16 }
  0xc4   : > { %v597_v59 = vld [vmem:[#allocation2] sm:$0xff]  ;;  %v596_v60 = vld [vmem:[#allocation2 + $0x30] sm:$0xff] }
  0xc5   : > { %647 = vmatprep.subr.mxu0 %v597_v59 }
  0xc6   : > { %648 = vmatpush1.msra.mxu0 %v596_v60  ;;  %v691_v62 = vpop.permute.xlu0 %690 }
  0xc7   : > { %1071 = vmatmul.mubr.msk.f32.vlgmr.msra.gmra.mxu0 %vm606_vm9, %v595_v61 }
 0x187   : > { %v1528_v0 = vpop.f32.mrf.mxu0 }
 0x188   : > { %v693_v1 = vadd.f32 %v691_v62, %v1528_v0 }
 0x189   : > { %v1531_v2 = vpop.f32.mrf.mxu0 }
 0x18a   : > { %v694_v3 = vadd.f32 %v691_v62, %v1531_v2  ;;  %v703_v4 = vsel %vm610_vm4, %v693_v1, 0.0 }
 0x18c   : > { %v704_v5 = vsel %vm610_vm4, %v694_v3, 0.0 }
 0x18d   : > { %v705_v8 = vadd.f32 %v704_v5, %v703_v4 }
 0x18f   : > { %706 = vadd.xlane.f32.xlu1 %v705_v8 }
 0x218   : > { %v707_v9 = vpop.xlane.xlu1 %706 }
 0x219   : > { %v709_v10 = vmul.f32 0.00390625, %v707_v9 }
 0x21b   : > { %v710_v12 = vsub.f32 %v693_v1, %v709_v10  ;;  %v711_v13 = vsub.f32 %v694_v3, %v709_v10 }
 0x21d   : > { %v712_v18 = vmul.f32 %v710_v12, %v710_v12  ;;  %v713_v19 = vmul.f32 %v711_v13, %v711_v13 }
 0x21f   : > { %v714_v20 = vsel %vm610_vm4, %v712_v18, 0.0  ;;  %v715_v21 = vsel %vm610_vm4, %v713_v19, 0.0 }
 0x220   : > { %v716_v22 = vadd.f32 %v715_v21, %v714_v20 }
 0x222   : > { %717 = vadd.xlane.f32.xlu0 %v716_v22 }
 0x2ab   : > { %v718_v25 = vpop.xlane.xlu0 %717 }
 0x2ac   : > { %v719_v28 = vmul.f32 0.00390625, %v718_v25 }
 0x2ae   : > { %v720_v29 = vadd.f32 1e-05, %v719_v28 }
 0x2b0   : > { %1144 = vrsqrt.f32 %v720_v29 }
 0x2bd   : > { %v1145_v30 = vpop.eup %1144 }
 0x2be   : > { %v722_v24 = vmul.f32 %v1145_v30, %v710_v12  ;;  %v723_v6 = vmul.f32 %v1145_v30, %v711_v13 }
 0x2c0   : > { %vm724_vm10 = vcmp.ge.f32.partialorder %v722_v24, 0.0  ;;  %vm725_vm11 = vcmp.ge.f32.partialorder %v723_v6, 0.0  ;;  %v727_v32 = vmul.f32 %v726_v23, %v722_v24  ;;  %v728_v33 = vmul.f32 %v726_v23, %v723_v6 }
 0x2c2   : > { %v730_v34 = vsel %vm725_vm11, %v723_v6, %v728_v33  ;;  %v729_v35 = vsel %vm724_vm10, %v722_v24, %v727_v32 }
 0x2c3   : > { %813 = vrot.lane.b32.xlu0 %v730_v34, %s1231_s19  ;;  %784 = vst [vmem:[#allocation2 + $0x28] sm:$0xf] %v730_v34  ;;  %811 = vrot.lane.b32.xlu1 %v729_v35, %s1231_s19  ;;  %783 = vst [vmem:[#allocation2 + $0x48] sm:$0xf] %v729_v35 }
 0x2c7   : > { %785 = vrot.lane.b32.xlu0 %v729_v35, %s1232_s23  ;;  %827 = vrot.lane.b32.xlu1 %v729_v35, %s1230_s18 }
 0x2cb   : > { %801 = vrot.lane.b32.xlu0 %v729_v35, %s1233_s24  ;;  %829 = vrot.lane.b32.xlu1 %v730_v34, %s1230_s18 }
 0x2cf   : > { %767 = vrot.lane.b32.xlu0 %v729_v35, %s1234_s25  ;;  %787 = vrot.lane.b32.xlu1 %v730_v34, %s1232_s23 }
 0x2d3   : > { %741 = vrot.lane.b32.xlu0 %v729_v35, %s1235_s26  ;;  %803 = vrot.lane.b32.xlu1 %v730_v34, %s1233_s24  ;;  %s1240_s24 = smov [#allocation6]  }
 0x2d7   : > { %757 = vrot.lane.b32.xlu0 %v729_v35, %s1670_s11  ;;  %769 = vrot.lane.b32.xlu1 %v730_v34, %s1234_s25  ;;  %s1167_s25 = sshll.u32 %s1240_s24, 4  ;;  %s1168_s25 = int_to_ptr.vmem [resolvable:$false] %s1167_s25 }
 0x2d8   : > { %s1169_s7 = scalar_lea.vmem %s1168_s25, 256 }
 0x2db   : > { %731 = vrot.lane.b32.xlu0 %v729_v35, %s1238_s28  ;;  %743 = vrot.lane.b32.xlu1 %v730_v34, %s1235_s26  ;;  %s1068_s26 = sld [smem:[#allocation3 + $0x1]] }
 0x2df   : > { %850 = vperm.xlu0 %1142, %v377_v38   ;;  %759 = vrot.lane.b32.xlu1 %v730_v34, %s1670_s11 }
 0x2e3   : > { %733 = vrot.lane.b32.xlu1 %v730_v34, %s1238_s28  ;;  %s364_s28 = sand.u32 1, %s1219_s14  }
 0x2e4   : > { %s1065_s8 = sshll.u32 %s364_s28, 3  ;;  %s974_s18 = scalar_lea.sflag [#allocation4], %s364_s28 }
 0x2e5   : > { %s366_s29 = scalar_lea.vmem [#allocation6], %s1065_s8 }
 0x2e6   : > { %s988_s30 = sshll.u32 %s366_s29, 4  ;;  %s989_s30 = int_to_ptr.vmem [resolvable:$true] %s988_s30 }
 0x2e7   : > { %s1163_s23 = scalar_lea.vmem %s989_s30, 128  ;;  %p1170_p13 = scmp.lt.s32.totalorder %s989_s30, %s1168_s25 }
 0x2e8   : > { %p1164_p9 = scmp.ne.s32.totalorder %s989_s30, %s1163_s23  ;;  %p1171_p0 = scmp.lt.s32.totalorder %s1169_s7, %s1163_s23 }
 0x2ea   : > { %p1165_p10 = pnand %p1164_p9, %p1334_p5  ;;  %p1172_p1 = por %p1171_p0, %p1170_p13 }
 0x2ec   : > { %p1166_p12 = pneg %p1165_p10 }
 0x2ee   : > { %p1173_p2 = pnand %p1172_p1, %p1166_p12 }
 0x335   : > { %v814_v39 = vpop.permute.xlu0 %813  ;;  %v812_v42 = vpop.permute.xlu1 %811 }
 0x336   : > { %v815_v43 = vsel %vm555_vm2, %v812_v42, %v814_v39  ;;  %v816_v46 = vsel %vm555_vm2, %v814_v39, %v812_v42 }
 0x337   : > { %v817_v47 = vmul.f32 %v815_v43, %v1443_v40  ;;  %v818_v48 = vmul.f32 %v816_v46, %v1445_v41 }
 0x339   : > { %v821_v49 = vrot.slane %v817_v47, 4  ;;  %v822_v52 = vrot.slane %v818_v48, 4  ;;  %v786_v53 = vpop.permute.xlu0 %785  ;;  %v828_v55 = vpop.permute.xlu1 %827 }
 0x33b   : > { %825 = vst [vmem:[#allocation2 + $0x8] sm:$0xf0] %v821_v49  ;;  %826 = vst [vmem:[#allocation2 + $0x20] sm:$0xf0] %v822_v52  ;;  %v837_v52 = vld [vmem:[%s1659_s5] sm:$0xf] }
 0x33d   : > { %v802_v56 = vpop.permute.xlu0 %801  ;;  %v830_v57 = vpop.permute.xlu1 %829 }
 0x33e   : > { %v831_v58 = vsel %vm580_vm0, %v828_v55, %v830_v57  ;;  %v832_v15 = vsel %vm580_vm0, %v830_v57, %v828_v55 }
 0x33f   : > { %v833_v16 = vmul.f32 %v831_v58, %v1420_v26  ;;  %v834_v40 = vmul.f32 %v832_v15, %v1423_v27 }
 0x341   : > { %835 = vst [vmem:[#allocation2 + $0x40] sm:$0xf] %v833_v16  ;;  %836 = vst [vmem:[#allocation2 + $0x38] sm:$0xf] %v834_v40  ;;  %v788_v41 = vpop.permute.xlu1 %787  ;;  %v768_v61 = vpop.permute.xlu0 %767 }
 0x342   : > { %v789_v59 = vsel %vm505_vm1, %v786_v53, %v788_v41  ;;  %v790_v60 = vsel %vm505_vm1, %v788_v41, %v786_v53 }
 0x343   : > { %v791_v62 = vmul.f32 %v789_v59, %v1436_v36  ;;  %v792_v1 = vmul.f32 %v790_v60, %v1439_v37 }
 0x345   : > { %v795_v3 = vrot.slane %v791_v62, 4  ;;  %v796_v4 = vrot.slane %v792_v1, 4  ;;  %v804_v5 = vpop.permute.xlu1 %803  ;;  %v742_v36 = vpop.permute.xlu0 %741 }
 0x346   : > { %v805_v26 = vsel %vm536_vm3, %v802_v56, %v804_v5  ;;  %v806_v27 = vsel %vm536_vm3, %v804_v5, %v802_v56 }
 0x347   : > { %799 = vst [vmem:[#allocation2 + $0x48] sm:$0xf0] %v795_v3  ;;  %800 = vst [vmem:[#allocation2 + $0x28] sm:$0xf0] %v796_v4  ;;  %v807_v8 = vmul.f32 %v805_v26, %v1448_v44  ;;  %v808_v9 = vmul.f32 %v806_v27, %v1450_v45  ;;  %v376_v3 = vld [vmem:[%s1658_s4] sm:$0xf] }
 0x348   : > { %v847_v10 = vld [vmem:[#allocation2 + $0x38] sm:$0xf]  ;;  %v846_v12 = vld [vmem:[#allocation2 + $0x40] sm:$0xf] }
 0x349   : > { %809 = vst [vmem:[#allocation2 + $0x8] sm:$0xf] %v807_v8  ;;  %810 = vst [vmem:[#allocation2 + $0x20] sm:$0xf] %v808_v9  ;;  %1072 = vmatprep.subr.msk.mxu1 %vm610_vm4, %v847_v10  ;;  %v770_v37 = vpop.permute.xlu1 %769  ;;  %v758_v28 = vpop.permute.xlu0 %757  ;;  %v955_v9 = vstv %s1068_s26 }
 0x34a   : > { %v771_v13 = vsel %vm478_vm5, %v768_v61, %v770_v37  ;;  %v772_v18 = vsel %vm478_vm5, %v770_v37, %v768_v61  ;;  %1073 = vmatpush1.msk.msra.mxu1 %vm610_vm4, %v846_v12 }
 0x34b   : > { %v773_v44 = vmul.f32 %v772_v18, %v1465_v54  ;;  %v774_v45 = vmul.f32 %v771_v13, %v1471_v63 }
 0x34d   : > { %v777_v19 = vrot.slane %v773_v44, 4  ;;  %v778_v20 = vrot.slane %v774_v45, 4  ;;  %v744_v21 = vpop.permute.xlu1 %743  ;;  %v732_v38 = vpop.permute.xlu0 %731 }
 0x34e   : > { %v745_v22 = vsel %vm422_vm6, %v742_v36, %v744_v21  ;;  %v746_v25 = vsel %vm422_vm6, %v744_v21, %v742_v36  ;;  %v843_v34 = vld [vmem:[#allocation2 + $0x28] sm:$0xff] }
 0x34f   : > { %781 = vst [vmem:[#allocation2 + $0x18] sm:$0xf0] %v777_v19  ;;  %782 = vst [vmem:[#allocation2 + $0x10] sm:$0xf0] %v778_v20  ;;  %v747_v29 = vmul.f32 %v746_v25, %v1485_v14  ;;  %v748_v30 = vmul.f32 %v745_v22, %v1488_v17  ;;  %v842_v35 = vld [vmem:[#allocation2 + $0x48] sm:$0xff] }
 0x350   : > { %v845_v23 = vld [vmem:[#allocation2 + $0x20] sm:$0xff]  ;;  %v844_v54 = vld [vmem:[#allocation2 + $0x8] sm:$0xff] }
 0x351   : > { %v751_v24 = vrot.slane %v747_v29, 4  ;;  %v752_v63 = vrot.slane %v748_v30, 4  ;;  %886 = vmatprep.subr.mxu1 %v845_v23  ;;  %v760_v6 = vpop.permute.xlu1 %759 }
 0x352   : > { %v761_v32 = vsel %vm453_vm7, %v758_v28, %v760_v6  ;;  %v762_v33 = vsel %vm453_vm7, %v760_v6, %v758_v28  ;;  %887 = vmatpush1.msra.mxu1 %v844_v54 }
 0x353   : > { %755 = vst [vmem:[#allocation2 + $0x30] sm:$0xf0] %v751_v24  ;;  %756 = vst [vmem:[#allocation2] sm:$0xf0] %v752_v63  ;;  %v763_v14 = vmul.f32 %v762_v33, %v1501_v31  ;;  %v764_v17 = vmul.f32 %v761_v32, %v1503_v7  ;;  %888 = vmatprep.subr.mxu1 %v843_v34 }
 0x354   : > { %889 = vmatpush1.msra.mxu1 %v842_v35 }
 0x355   : > { %765 = vst [vmem:[#allocation2 + $0x18] sm:$0xf] %v763_v14  ;;  %766 = vst [vmem:[#allocation2 + $0x10] sm:$0xf] %v764_v17  ;;  %v734_v39 = vpop.permute.xlu1 %733 }
 0x356   : > { %v735_v42 = vsel %vm397_vm8, %v732_v38, %v734_v39  ;;  %v736_v43 = vsel %vm397_vm8, %v734_v39, %v732_v38 }
 0x357   : > { %v737_v46 = vmul.f32 %v736_v43, %v1513_v50  ;;  %v738_v47 = vmul.f32 %v735_v42, %v1516_v51 }
 0x359   : > { %739 = vst [vmem:[#allocation2 + $0x30] sm:$0xf] %v737_v46  ;;  %740 = vst [vmem:[#allocation2] sm:$0xf] %v738_v47 }
 0x35a   : > { %v851_v11 = vpop.permute.xlu0 %850 }
 0x35c   : > { %v841_v31 = vld [vmem:[#allocation2 + $0x10] sm:$0xff]  ;;  %v840_v7 = vld [vmem:[#allocation2 + $0x18] sm:$0xff] }
 0x35d   : > { %890 = vmatprep.subr.mxu1 %v841_v31 }
 0x35e   : > { %891 = vmatpush1.msra.mxu1 %v840_v7 }
 0x360   : > { %v839_v48 = vld [vmem:[#allocation2] sm:$0xff]  ;;  %v838_v49 = vld [vmem:[#allocation2 + $0x30] sm:$0xff] }
 0x361   : > { %892 = vmatprep.subr.mxu1 %v839_v48 }
 0x362   : > { %893 = vmatpush1.msra.mxu1 %v838_v49 }
 0x363   : > { %1074 = vmatmul.mubr.msk.f32.vlgmr.msra.gmra.mxu1 %vm606_vm9, %v837_v52 }
 0x423   : > { %v928_v50 = vpop.f32.mrf.mxu1 }
 0x424   : > { %v929_v53 = vadd.f32 %v928_v50, %v851_v11 }
 0x425   : > { %v930_v51 = vpop.f32.mrf.mxu1 }
 0x426   : > { %v931_v55 = vadd.f32 %v930_v51, %v851_v11  ;;  %v933_v56 = vsel %vm610_vm4, %v929_v53, 0.0 }
 0x428   : > { %v934_v57 = vsel %vm610_vm4, %v931_v55, 0.0 }
 0x429   : > { %v935_v58 = vadd.f32 %v934_v57, %v933_v56 }
 0x42b   : > { %936 = vadd.xlane.f32.xlu1 %v935_v58 }
 0x4b4   : > { %v937_v15 = vpop.xlane.xlu1 %936 }
 0x4b5   : > { %v938_v16 = vmul.f32 0.00390625, %v937_v15 }
 0x4b7   : > { %v939_v40 = vsub.f32 %v929_v53, %v938_v16  ;;  %v940_v41 = vsub.f32 %v931_v55, %v938_v16 }
 0x4b9   : > { %v941_v59 = vmul.f32 %v939_v40, %v939_v40  ;;  %v942_v60 = vmul.f32 %v940_v41, %v940_v41 }
 0x4bb   : > { %v943_v61 = vsel %vm610_vm4, %v941_v59, 0.0  ;;  %v944_v62 = vsel %vm610_vm4, %v942_v60, 0.0 }
 0x4bc   : > { %v945_v1 = vadd.f32 %v944_v62, %v943_v61 }
 0x4be   : > { %946 = vadd.xlane.f32.xlu0 %v945_v1 }
 0x4d4   : > { %697 = vperm.xlu0 %1142, %v376_v3  }
 0x547   : > { %v947_v4 = vpop.xlane.xlu0 %946 }
 0x548   : > { %v948_v5 = vmul.f32 0.00390625, %v947_v4 }
 0x54a   : > { %v949_v26 = vadd.f32 1e-05, %v948_v5 }
 0x54c   : > { %1146 = vrsqrt.f32 %v949_v26 }
 0x54f   : > { %v698_v27 = vpop.permute.xlu0 %697 }
 0x550   : > { %v699_v36 = vrot.slane %v698_v27, 4 }
 0x552   : > { %v701_v20 = vadd.f32 %v699_v36, %v1528_v0  ;;  %v702_v21 = vadd.f32 %v699_v36, %v1531_v2 }
 0x559   : > { %v1147_v8 = vpop.eup %1146 }
 0x55a   : > { %v951_v10 = vmul.f32 %v1147_v8, %v939_v40  ;;  %v952_v12 = vmul.f32 %v1147_v8, %v940_v41 }
 0x55c   : > { %vm953_vm12 = vcmp.ge.f32.partialorder %v951_v10, 0.0  ;;  %vm954_vm13 = vcmp.ge.f32.partialorder %v952_v12, 0.0  ;;  %v956_v37 = vmul.f32 %v955_v9, %v951_v10  ;;  %v957_v13 = vmul.f32 %v955_v9, %v952_v12 }
 0x55e   : > { %v958_v18 = vsel %vm953_vm12, %v951_v10, %v956_v37  ;;  %v959_v44 = vsel %vm954_vm13, %v952_v12, %v957_v13 }
 0x55f   : > { %v962_v45 = vrot.slane %v958_v18, 4  ;;  %v963_v19 = vrot.slane %v959_v44, 4 }
 0x561   : > { %v966_v22 = vadd.f32 %v962_v45, %v701_v20  ;;  %v967_v25 = vadd.f32 %v963_v19, %v702_v21 }
 0x563   : > { %v970_v28 = vcombine.high %v966_v22, %v967_v25 }
 0x565   : > { %972 = vst [vmem:[%s366_s29] sm:$0xff] %v970_v28 }
 0x566   : > { %1176 = shalt.err (!%p1173_p2)
}
 0x567   : > { %s1177_s26 = scalar_lea.hbm %s986_s12, 128  ;;  %s1181_s27 = scalar_lea.hbm %s1664_s10, 256 }
 0x568   : > { %p1178_p3 = scmp.ne.s32.totalorder %s986_s12, %s1177_s26  ;;  %p1182_p8 = scmp.lt.s32.totalorder %s986_s12, %s1664_s10 }
 0x569   : > { %p1183_p11 = scmp.lt.s32.totalorder %s1181_s27, %s1177_s26 }
 0x56a   : > { %p1179_p4 = pnand %p1178_p3, %p1334_p5 }
 0x56b   : > { %p1184_p9 = por %p1183_p11, %p1182_p8 }
 0x56c   : > { %p1180_p7 = pneg %p1179_p4 }
 0x56e   : > { %p1185_p10 = pnand %p1184_p9, %p1180_p7 }
 0x570   : > { %1188 = shalt.err (!%p1185_p10)
}
 0x571   : > { %1086 = dma.vmem_to_hbm [thread:$0]  (%p1334_p5), %s989_s30, 128, %s986_s12, %s974_s18  }
 0x572 PF: > { %p1098_p12 = scmp.ge.s32.totalorder %s1227_s16, 2  ;;  %s1000_s19 = sand.u32 1, %s1215_s13  }
 0x573   : > { %s1001_s23 = scalar_lea.sflag [#allocation4], %s1000_s19 }
 0x574   : > { %p1093_p13 = pnand %p1098_p12, %p1338_p6 }
 0x576   : > { %p1094_p0 = pneg %p1093_p13 }
 0x578   : > { %1210 = dma.done.wait (%p1094_p0), %s1001_s23, 128  }
 0x579   : > { %1212 = vsyncadd (%p1094_p0), %s1001_s23, 4294967168  ;;  %p21_p1 = scmp.ge.s32.totalorder %s1321_s17, 4   ;;  %s1671_s13 = smov %s1219_s14 }
 0x57a   : > { %s1672_s14 = smov %s1223_s15  ;;  %s1673_s15 = smov %s1332_s20 }
 0x57b   : > { %s1674_s16 = smov %s1321_s17  ;;  %23 = sbr.rel (!%p21_p1) target bundleno = 4 (0x4), region = 100 }
 0x580   :  { %1006 = vsyncpa [#allocation4], 1 }
 0x581   :  { %1008 = vsyncpa [#allocation4 + $0x1], 1 }
 0x582   :  { %1009 = vsyncpa [#allocation5], 1 }
 0x583   :  { %1011 = vsyncpa [#allocation5 + $0x1], 1 }

</bundles_post_ra>
